<compile_context>
chip_gen: v7x
topology: tpu7x:2x2x1
jax: 0.10.0
libtpu: 0.0.40
codegen_flags: <defaults>
</compile_context>

<pallas_src>
import jax
import jax.numpy as jnp
import numpy as np
from jax.experimental import pallas as pl
from jax.experimental.pallas import tpu as pltpu

# ------------------------- model hyper-parameters ---------------------------
QST_VOCAB_SIZE = 50
WORD_EMBED_SIZE = 32   # word_embed_size
HIDDEN_SIZE = 32       # hidden_size
NUM_LAYERS = 2         # num_layers
EMBED_SIZE = 32        # embed_size
BATCH = 2
SEQ = 8
BP = 8                 # batch padded to one f32 sublane tile


# ------------------------------- Pallas kernel ------------------------------
def qst_encoder_kernel(q_ref,        # (S*BP, 1) int32 token ids, time-major, batch padded
                       emb_ref,      # (V, E)   f32 embedding table
                       win0_ref,     # (E, 8H)  layer-0 input weights, interleaved gate cols, i/f/o pre-scaled by 0.5
                       wrec_ref,     # (2H, 8H) fused recurrent weights ([h0; h1] rows), interleaved, scaled
                       bfull_ref,    # (1, 8H)  fused bias (b_ih+b_hh per layer), interleaved, scaled
                       fcw_ref,      # (2*L*H, EMBED)
                       fcb_ref,      # (1, EMBED)
                       out_ref):     # (B, EMBED)
    SB = q_ref.shape[0]
    V = emb_ref.shape[0]
    H2 = wrec_ref.shape[0]          # 2H
    H = H2 // 2
    S = SB // BP
    B = out_ref.shape[0]

    # ---- prologue (off the serial path) ------------------------------------
    # embedding gather as a one-hot MXU matmul, then tanh, then the layer-0
    # input projection for ALL timesteps (plus both layers' biases) in a single
    # (S*BP, E) @ (E, 8H) dot, already in the interleaved/scaled gate layout.
    ids = q_ref[...]                                                  # (S*BP, 1)
    onehot = (jax.lax.broadcasted_iota(jnp.int32, (SB, V), 1) == ids
              ).astype(jnp.float32)                                   # (S*BP, V)
    x = jnp.tanh(jnp.dot(onehot, emb_ref[...],
                         preferred_element_type=jnp.float32))         # (S*BP, E)
    pre = (jnp.dot(x, win0_ref[...], preferred_element_type=jnp.float32)
           + bfull_ref[...])                                          # (S*BP, 8H)

    wrec = wrec_ref[...]
    bfull = bfull_ref[...]

    def cell_pair(gates_scaled, ccat):
        # ONE EUP pass over the full 256-lane fused gate tensor.
        # sigmoid(x) = 0.5*tanh(0.5*x) + 0.5 ; the 0.5 pre-scale of the i/f/o
        # columns is already baked into the weights/bias.
        th = jnp.tanh(gates_scaled)
        icat = 0.5 * th[:, 0 * H2:1 * H2] + 0.5
        fcat = 0.5 * th[:, 1 * H2:2 * H2] + 0.5
        gcat = th[:, 2 * H2:3 * H2]
        ocat = 0.5 * th[:, 3 * H2:4 * H2] + 0.5
        ccat_new = fcat * ccat + icat * gcat
        hcat_new = ocat * jnp.tanh(ccat_new)
        return hcat_new, ccat_new

    # super-step 0: layer-0 step 0 (zero initial state -> no matmul needed);
    # the layer-1 half computes a dummy "step -1" which is masked back to zero.
    hcat, ccat = cell_pair(pre[0:BP, :], jnp.zeros((BP, H2), jnp.float32))
    l0_mask = (jax.lax.broadcasted_iota(jnp.int32, (1, H2), 1) < H
               ).astype(jnp.float32)
    hcat = hcat * l0_mask
    ccat = ccat * l0_mask

    # super-steps 1..S-1 (skewed): layer-0 step k and layer-1 step k-1 share one
    # fused (BP,2H)@(2H,8H) matmul.  hcat = [h0(k-1), h1(k-2)] is already laid
    # out as the LHS, so there is no per-step concat on the serial chain.
    for k in range(1, S):
        gates = (jnp.dot(hcat, wrec, preferred_element_type=jnp.float32)
                 + pre[k * BP:(k + 1) * BP, :])
        hcat, ccat = cell_pair(gates, ccat)

    # layer-0 finished at super-step S-1: save its final state before the tail.
    h0_fin = hcat[:, 0:H]
    c0_fin = ccat[:, 0:H]

    # super-step S: layer-1 step S-1 (the layer-0 half computes a dummy step
    # that is discarded).
    gates = jnp.dot(hcat, wrec, preferred_element_type=jnp.float32) + bfull
    hcat, ccat = cell_pair(gates, ccat)
    h1_fin = hcat[:, H:H2]
    c1_fin = ccat[:, H:H2]

    # ---- epilogue: cat((hidden, cell), 2).transpose(0,1).reshape(B,-1) ------
    # flat per-batch ordering: [h_layer0, c_layer0, h_layer1, c_layer1]
    feat = jnp.tanh(jnp.concatenate([h0_fin, c0_fin, h1_fin, c1_fin], axis=1))
    res = (jnp.dot(feat, fcw_ref[...], preferred_element_type=jnp.float32)
           + fcb_ref[...])                                            # (BP, EMBED)
    out_ref[...] = res[0:B, :]                                        # only real rows


def qst_encoder_pallas(question, params):
    """question: (B, S) int32 token ids (PyTorch batch-first)."""
    B, S = question.shape
    # pad the batch to BP=8 rows (one sublane tile); dummy rows use token 0.
    q_pad = jnp.zeros((BP, S), jnp.int32).at[:B, :].set(question.astype(jnp.int32))
    # time-major flattened ids: row t*BP + b == q_pad[b, t]
    q_ids = jnp.transpose(q_pad).reshape(S * BP, 1)

    vmem = pl.BlockSpec(memory_space=pltpu.MemorySpace.VMEM)
    args = (q_ids, params["emb"],
            params["win0_full"], params["wrec_full"], params["b_full"],
            params["fcw_T"], params["fcb"])

    return pl.pallas_call(
        qst_encoder_kernel,
        out_shape=jax.ShapeDtypeStruct((B, EMBED_SIZE), jnp.float32),
        in_specs=[vmem] * len(args),
        out_specs=vmem,
    )(*args)


# ------------------------- parameter init (deterministic) -------------------
def init_params(key):
    ks = jax.random.split(key, 12)
    H, E = HIDDEN_SIZE, WORD_EMBED_SIZE
    bound = 1.0 / np.sqrt(H)

    def u(k, shape):
        return jax.random.uniform(k, shape, jnp.float32, -bound, bound)

    emb = jax.random.normal(ks[0], (QST_VOCAB_SIZE, E), jnp.float32)

    # PyTorch LSTM weights: W_ih (4H, in), W_hh (4H, H), b_ih (4H,), b_hh (4H,)
    wih0 = u(ks[1], (4 * H, E))
    whh0 = u(ks[2], (4 * H, H))
    bih0 = u(ks[3], (4 * H,))
    bhh0 = u(ks[4], (4 * H,))
    wih1 = u(ks[5], (4 * H, H))
    whh1 = u(ks[6], (4 * H, H))
    bih1 = u(ks[7], (4 * H,))
    bhh1 = u(ks[8], (4 * H,))

    # TODO(synk): forward references self.fc but __init__ defines self.fc2 (bug
    # in the reference module); we treat fc == fc2 == Linear(2*L*H, embed_size).
    fcw = u(ks[9], (EMBED_SIZE, 2 * NUM_LAYERS * H))
    fcb = u(ks[10], (EMBED_SIZE,))

    b0 = (bih0 + bhh0).reshape(1, 4 * H)
    b1 = (bih1 + bhh1).reshape(1, 4 * H)

    def interleave(l0_T, l1_T):
        # (K,4H) x2 in PyTorch gate order [i,f,g,o] -> (K,8H) in fused layout
        # [i0,i1,f0,f1,g0,g1,o0,o1]
        blocks = []
        for gi in range(4):
            blocks.append(l0_T[:, gi * H:(gi + 1) * H])
            blocks.append(l1_T[:, gi * H:(gi + 1) * H])
        return jnp.concatenate(blocks, axis=1)

    win0_full = interleave(wih0.T, jnp.zeros((E, 4 * H), jnp.float32))      # (E, 8H)
    wrec_full = jnp.concatenate(
        [interleave(whh0.T, wih1.T),                                        # rows for h0
         interleave(jnp.zeros((H, 4 * H), jnp.float32), whh1.T)], axis=0)   # rows for h1
    b_full = interleave(b0, b1)                                             # (1, 8H)

    # bake the 0.5 pre-scale (sigmoid(x)=0.5*tanh(0.5x)+0.5) into i/f/o columns
    scale = jnp.concatenate([jnp.full((2 * H,), 0.5, jnp.float32),   # i0,i1
                             jnp.full((2 * H,), 0.5, jnp.float32),   # f0,f1
                             jnp.full((2 * H,), 1.0, jnp.float32),   # g0,g1
                             jnp.full((2 * H,), 0.5, jnp.float32)]   # o0,o1
                            ).reshape(1, 8 * H)
    win0_full = win0_full * scale
    wrec_full = wrec_full * scale
    b_full = b_full * scale

    return {
        "emb": emb,
        # fused / pre-scaled kernel weights
        "win0_full": win0_full,
        "wrec_full": wrec_full,
        "b_full": b_full,
        "fcw_T": fcw.T,
        "fcb": fcb.reshape(1, EMBED_SIZE),
        # plain weights for the pure-JAX reference
        "wih0_T": wih0.T, "whh0_T": whh0.T, "b0": b0,
        "wih1_T": wih1.T, "whh1_T": whh1.T, "b1": b1,
    }


# ----------------------------- pure-JAX reference ---------------------------
def qst_encoder_ref(question, params):
    H = HIDDEN_SIZE
    x = jnp.tanh(params["emb"][question])          # (B, S, E)
    x = jnp.transpose(x, (1, 0, 2))                # (S, B, E)
    B = x.shape[1]

    def cell(xt, h, c, wih_T, whh_T, b):
        g = xt @ wih_T + h @ whh_T + b
        i = jax.nn.sigmoid(g[:, 0:H])
        f = jax.nn.sigmoid(g[:, H:2 * H])
        gg = jnp.tanh(g[:, 2 * H:3 * H])
        o = jax.nn.sigmoid(g[:, 3 * H:4 * H])
        c = f * c + i * gg
        h = o * jnp.tanh(c)
        return h, c

    h0 = c0 = h1 = c1 = jnp.zeros((B, H), jnp.float32)
    for t in range(x.shape[0]):
        h0, c0 = cell(x[t], h0, c0, params["wih0_T"], params["whh0_T"], params["b0"])
        h1, c1 = cell(h0, h1, c1, params["wih1_T"], params["whh1_T"], params["b1"])
    feat = jnp.tanh(jnp.concatenate([h0, c0, h1, c1], axis=1))
    return feat @ params["fcw_T"] + params["fcb"]


# ------------------------------------ main -----------------------------------
if __name__ == "__main__":
    key = jax.random.PRNGKey(0)
    kq, kp = jax.random.split(key)
    params = init_params(kp)

    question = jax.random.randint(kq, (BATCH, SEQ), 0, QST_VOCAB_SIZE, jnp.int32)

    out = qst_encoder_pallas(question, params)
    out = jax.block_until_ready(out)

    ref = qst_encoder_ref(question, params)
    assert out.shape == (BATCH, EMBED_SIZE)
    assert np.allclose(np.asarray(out), np.asarray(ref), rtol=1e-4, atol=1e-4)

    print("KERNEL_OK")
</pallas_src>

<mosaic_0001>
module attributes {stable_mosaic.version = 11 : i64} {
  func.func @qst_encoder_kernel(%arg0: memref<64x1xi32, #tpu.memory_space<vmem>>, %arg1: memref<50x32xf32, #tpu.memory_space<vmem>>, %arg2: memref<32x256xf32, #tpu.memory_space<vmem>>, %arg3: memref<64x256xf32, #tpu.memory_space<vmem>>, %arg4: memref<1x256xf32, #tpu.memory_space<vmem>>, %arg5: memref<128x32xf32, #tpu.memory_space<vmem>>, %arg6: memref<1x32xf32, #tpu.memory_space<vmem>>, %arg7: memref<2x32xf32, #tpu.memory_space<vmem>>) attributes {dimension_semantics = [], scalar_prefetch = 0 : i64, scratch_operands = 0 : i64, tpu.core_type = #tpu.core_type<tc>} {
    %c0 = arith.constant 0 : index
    %c0_0 = arith.constant 0 : index
    %0 = vector.load %arg0[%c0, %c0_0] : memref<64x1xi32, #tpu.memory_space<vmem>>, vector<64x1xi32>
    %1 = tpu.iota {dimensions = array<i32: 1>} : vector<64x50xi32>
    %2 = vector.broadcast %0 : vector<64x1xi32> to vector<64x50xi32>
    %3 = arith.cmpi eq, %1, %2 : vector<64x50xi32>
    %4 = arith.extui %3 : vector<64x50xi1> to vector<64x50xi32>
    %5 = arith.sitofp %4 : vector<64x50xi32> to vector<64x50xf32>
    %c0_1 = arith.constant 0 : index
    %c0_2 = arith.constant 0 : index
    %6 = vector.load %arg1[%c0_1, %c0_2] : memref<50x32xf32, #tpu.memory_space<vmem>>, vector<50x32xf32>
    %cst = arith.constant dense<0.000000e+00> : vector<64x32xf32>
    %7 = tpu.matmul %5, %6, %cst {dimension_numbers = #tpu.dot_dimension_numbers<[1], [0], [0], [1], [0, 0, 1, 1], [], []>} : vector<64x50xf32>, vector<50x32xf32>, vector<64x32xf32> -> vector<64x32xf32>
    %8 = math.tanh %7 : vector<64x32xf32>
    %c0_3 = arith.constant 0 : index
    %c0_4 = arith.constant 0 : index
    %9 = vector.load %arg2[%c0_3, %c0_4] : memref<32x256xf32, #tpu.memory_space<vmem>>, vector<32x256xf32>
    %cst_5 = arith.constant dense<0.000000e+00> : vector<64x256xf32>
    %10 = tpu.matmul %8, %9, %cst_5 {dimension_numbers = #tpu.dot_dimension_numbers<[1], [0], [0], [1], [0, 0, 1, 1], [], []>} : vector<64x32xf32>, vector<32x256xf32>, vector<64x256xf32> -> vector<64x256xf32>
    %c0_6 = arith.constant 0 : index
    %c0_7 = arith.constant 0 : index
    %11 = vector.load %arg4[%c0_6, %c0_7] : memref<1x256xf32, #tpu.memory_space<vmem>>, vector<1x256xf32>
    %12 = vector.broadcast %11 : vector<1x256xf32> to vector<64x256xf32>
    %13 = arith.addf %10, %12 : vector<64x256xf32>
    %c0_8 = arith.constant 0 : index
    %c0_9 = arith.constant 0 : index
    %14 = vector.load %arg3[%c0_8, %c0_9] : memref<64x256xf32, #tpu.memory_space<vmem>>, vector<64x256xf32>
    %c0_10 = arith.constant 0 : index
    %c0_11 = arith.constant 0 : index
    %15 = vector.load %arg4[%c0_10, %c0_11] : memref<1x256xf32, #tpu.memory_space<vmem>>, vector<1x256xf32>
    %16 = vector.extract_strided_slice %13 {offsets = [0, 0], sizes = [8, 256], strides = [1, 1]} : vector<64x256xf32> to vector<8x256xf32>
    %cst_12 = arith.constant 0.000000e+00 : f32
    %17 = vector.broadcast %cst_12 : f32 to vector<8x64xf32>
    %18 = math.tanh %16 : vector<8x256xf32>
    %19 = vector.extract_strided_slice %18 {offsets = [0, 0], sizes = [8, 64], strides = [1, 1]} : vector<8x256xf32> to vector<8x64xf32>
    %cst_13 = arith.constant 5.000000e-01 : f32
    %20 = vector.broadcast %cst_13 : f32 to vector<8x64xf32>
    %21 = arith.mulf %20, %19 : vector<8x64xf32>
    %cst_14 = arith.constant 5.000000e-01 : f32
    %22 = vector.broadcast %cst_14 : f32 to vector<8x64xf32>
    %23 = arith.addf %21, %22 : vector<8x64xf32>
    %24 = vector.extract_strided_slice %18 {offsets = [0, 64], sizes = [8, 64], strides = [1, 1]} : vector<8x256xf32> to vector<8x64xf32>
    %cst_15 = arith.constant 5.000000e-01 : f32
    %25 = vector.broadcast %cst_15 : f32 to vector<8x64xf32>
    %26 = arith.mulf %25, %24 : vector<8x64xf32>
    %cst_16 = arith.constant 5.000000e-01 : f32
    %27 = vector.broadcast %cst_16 : f32 to vector<8x64xf32>
    %28 = arith.addf %26, %27 : vector<8x64xf32>
    %29 = vector.extract_strided_slice %18 {offsets = [0, 128], sizes = [8, 64], strides = [1, 1]} : vector<8x256xf32> to vector<8x64xf32>
    %30 = vector.extract_strided_slice %18 {offsets = [0, 192], sizes = [8, 64], strides = [1, 1]} : vector<8x256xf32> to vector<8x64xf32>
    %cst_17 = arith.constant 5.000000e-01 : f32
    %31 = vector.broadcast %cst_17 : f32 to vector<8x64xf32>
    %32 = arith.mulf %31, %30 : vector<8x64xf32>
    %cst_18 = arith.constant 5.000000e-01 : f32
    %33 = vector.broadcast %cst_18 : f32 to vector<8x64xf32>
    %34 = arith.addf %32, %33 : vector<8x64xf32>
    %35 = arith.mulf %28, %17 : vector<8x64xf32>
    %36 = arith.mulf %23, %29 : vector<8x64xf32>
    %37 = arith.addf %35, %36 : vector<8x64xf32>
    %38 = math.tanh %37 : vector<8x64xf32>
    %39 = arith.mulf %34, %38 : vector<8x64xf32>
    %40 = tpu.iota {dimensions = array<i32: 1>} : vector<1x64xi32>
    %c32_i32 = arith.constant 32 : i32
    %41 = vector.broadcast %c32_i32 : i32 to vector<1x64xi32>
    %42 = arith.cmpi slt, %40, %41 : vector<1x64xi32>
    %43 = arith.extui %42 : vector<1x64xi1> to vector<1x64xi32>
    %44 = arith.sitofp %43 : vector<1x64xi32> to vector<1x64xf32>
    %45 = vector.broadcast %44 : vector<1x64xf32> to vector<8x64xf32>
    %46 = arith.mulf %39, %45 : vector<8x64xf32>
    %47 = vector.broadcast %44 : vector<1x64xf32> to vector<8x64xf32>
    %48 = arith.mulf %37, %47 : vector<8x64xf32>
    %cst_19 = arith.constant dense<0.000000e+00> : vector<8x256xf32>
    %49 = tpu.matmul %46, %14, %cst_19 {dimension_numbers = #tpu.dot_dimension_numbers<[1], [0], [0], [1], [0, 0, 1, 1], [], []>} : vector<8x64xf32>, vector<64x256xf32>, vector<8x256xf32> -> vector<8x256xf32>
    %50 = vector.extract_strided_slice %13 {offsets = [8, 0], sizes = [8, 256], strides = [1, 1]} : vector<64x256xf32> to vector<8x256xf32>
    %51 = arith.addf %49, %50 : vector<8x256xf32>
    %52 = math.tanh %51 : vector<8x256xf32>
    %53 = vector.extract_strided_slice %52 {offsets = [0, 0], sizes = [8, 64], strides = [1, 1]} : vector<8x256xf32> to vector<8x64xf32>
    %cst_20 = arith.constant 5.000000e-01 : f32
    %54 = vector.broadcast %cst_20 : f32 to vector<8x64xf32>
    %55 = arith.mulf %54, %53 : vector<8x64xf32>
    %cst_21 = arith.constant 5.000000e-01 : f32
    %56 = vector.broadcast %cst_21 : f32 to vector<8x64xf32>
    %57 = arith.addf %55, %56 : vector<8x64xf32>
    %58 = vector.extract_strided_slice %52 {offsets = [0, 64], sizes = [8, 64], strides = [1, 1]} : vector<8x256xf32> to vector<8x64xf32>
    %cst_22 = arith.constant 5.000000e-01 : f32
    %59 = vector.broadcast %cst_22 : f32 to vector<8x64xf32>
    %60 = arith.mulf %59, %58 : vector<8x64xf32>
    %cst_23 = arith.constant 5.000000e-01 : f32
    %61 = vector.broadcast %cst_23 : f32 to vector<8x64xf32>
    %62 = arith.addf %60, %61 : vector<8x64xf32>
    %63 = vector.extract_strided_slice %52 {offsets = [0, 128], sizes = [8, 64], strides = [1, 1]} : vector<8x256xf32> to vector<8x64xf32>
    %64 = vector.extract_strided_slice %52 {offsets = [0, 192], sizes = [8, 64], strides = [1, 1]} : vector<8x256xf32> to vector<8x64xf32>
    %cst_24 = arith.constant 5.000000e-01 : f32
    %65 = vector.broadcast %cst_24 : f32 to vector<8x64xf32>
    %66 = arith.mulf %65, %64 : vector<8x64xf32>
    %cst_25 = arith.constant 5.000000e-01 : f32
    %67 = vector.broadcast %cst_25 : f32 to vector<8x64xf32>
    %68 = arith.addf %66, %67 : vector<8x64xf32>
    %69 = arith.mulf %62, %48 : vector<8x64xf32>
    %70 = arith.mulf %57, %63 : vector<8x64xf32>
    %71 = arith.addf %69, %70 : vector<8x64xf32>
    %72 = math.tanh %71 : vector<8x64xf32>
    %73 = arith.mulf %68, %72 : vector<8x64xf32>
    %cst_26 = arith.constant dense<0.000000e+00> : vector<8x256xf32>
    %74 = tpu.matmul %73, %14, %cst_26 {dimension_numbers = #tpu.dot_dimension_numbers<[1], [0], [0], [1], [0, 0, 1, 1], [], []>} : vector<8x64xf32>, vector<64x256xf32>, vector<8x256xf32> -> vector<8x256xf32>
    %75 = vector.extract_strided_slice %13 {offsets = [16, 0], sizes = [8, 256], strides = [1, 1]} : vector<64x256xf32> to vector<8x256xf32>
    %76 = arith.addf %74, %75 : vector<8x256xf32>
    %77 = math.tanh %76 : vector<8x256xf32>
    %78 = vector.extract_strided_slice %77 {offsets = [0, 0], sizes = [8, 64], strides = [1, 1]} : vector<8x256xf32> to vector<8x64xf32>
    %cst_27 = arith.constant 5.000000e-01 : f32
    %79 = vector.broadcast %cst_27 : f32 to vector<8x64xf32>
    %80 = arith.mulf %79, %78 : vector<8x64xf32>
    %cst_28 = arith.constant 5.000000e-01 : f32
    %81 = vector.broadcast %cst_28 : f32 to vector<8x64xf32>
    %82 = arith.addf %80, %81 : vector<8x64xf32>
    %83 = vector.extract_strided_slice %77 {offsets = [0, 64], sizes = [8, 64], strides = [1, 1]} : vector<8x256xf32> to vector<8x64xf32>
    %cst_29 = arith.constant 5.000000e-01 : f32
    %84 = vector.broadcast %cst_29 : f32 to vector<8x64xf32>
    %85 = arith.mulf %84, %83 : vector<8x64xf32>
    %cst_30 = arith.constant 5.000000e-01 : f32
    %86 = vector.broadcast %cst_30 : f32 to vector<8x64xf32>
    %87 = arith.addf %85, %86 : vector<8x64xf32>
    %88 = vector.extract_strided_slice %77 {offsets = [0, 128], sizes = [8, 64], strides = [1, 1]} : vector<8x256xf32> to vector<8x64xf32>
    %89 = vector.extract_strided_slice %77 {offsets = [0, 192], sizes = [8, 64], strides = [1, 1]} : vector<8x256xf32> to vector<8x64xf32>
    %cst_31 = arith.constant 5.000000e-01 : f32
    %90 = vector.broadcast %cst_31 : f32 to vector<8x64xf32>
    %91 = arith.mulf %90, %89 : vector<8x64xf32>
    %cst_32 = arith.constant 5.000000e-01 : f32
    %92 = vector.broadcast %cst_32 : f32 to vector<8x64xf32>
    %93 = arith.addf %91, %92 : vector<8x64xf32>
    %94 = arith.mulf %87, %71 : vector<8x64xf32>
    %95 = arith.mulf %82, %88 : vector<8x64xf32>
    %96 = arith.addf %94, %95 : vector<8x64xf32>
    %97 = math.tanh %96 : vector<8x64xf32>
    %98 = arith.mulf %93, %97 : vector<8x64xf32>
    %cst_33 = arith.constant dense<0.000000e+00> : vector<8x256xf32>
    %99 = tpu.matmul %98, %14, %cst_33 {dimension_numbers = #tpu.dot_dimension_numbers<[1], [0], [0], [1], [0, 0, 1, 1], [], []>} : vector<8x64xf32>, vector<64x256xf32>, vector<8x256xf32> -> vector<8x256xf32>
    %100 = vector.extract_strided_slice %13 {offsets = [24, 0], sizes = [8, 256], strides = [1, 1]} : vector<64x256xf32> to vector<8x256xf32>
    %101 = arith.addf %99, %100 : vector<8x256xf32>
    %102 = math.tanh %101 : vector<8x256xf32>
    %103 = vector.extract_strided_slice %102 {offsets = [0, 0], sizes = [8, 64], strides = [1, 1]} : vector<8x256xf32> to vector<8x64xf32>
    %cst_34 = arith.constant 5.000000e-01 : f32
    %104 = vector.broadcast %cst_34 : f32 to vector<8x64xf32>
    %105 = arith.mulf %104, %103 : vector<8x64xf32>
    %cst_35 = arith.constant 5.000000e-01 : f32
    %106 = vector.broadcast %cst_35 : f32 to vector<8x64xf32>
    %107 = arith.addf %105, %106 : vector<8x64xf32>
    %108 = vector.extract_strided_slice %102 {offsets = [0, 64], sizes = [8, 64], strides = [1, 1]} : vector<8x256xf32> to vector<8x64xf32>
    %cst_36 = arith.constant 5.000000e-01 : f32
    %109 = vector.broadcast %cst_36 : f32 to vector<8x64xf32>
    %110 = arith.mulf %109, %108 : vector<8x64xf32>
    %cst_37 = arith.constant 5.000000e-01 : f32
    %111 = vector.broadcast %cst_37 : f32 to vector<8x64xf32>
    %112 = arith.addf %110, %111 : vector<8x64xf32>
    %113 = vector.extract_strided_slice %102 {offsets = [0, 128], sizes = [8, 64], strides = [1, 1]} : vector<8x256xf32> to vector<8x64xf32>
    %114 = vector.extract_strided_slice %102 {offsets = [0, 192], sizes = [8, 64], strides = [1, 1]} : vector<8x256xf32> to vector<8x64xf32>
    %cst_38 = arith.constant 5.000000e-01 : f32
    %115 = vector.broadcast %cst_38 : f32 to vector<8x64xf32>
    %116 = arith.mulf %115, %114 : vector<8x64xf32>
    %cst_39 = arith.constant 5.000000e-01 : f32
    %117 = vector.broadcast %cst_39 : f32 to vector<8x64xf32>
    %118 = arith.addf %116, %117 : vector<8x64xf32>
    %119 = arith.mulf %112, %96 : vector<8x64xf32>
    %120 = arith.mulf %107, %113 : vector<8x64xf32>
    %121 = arith.addf %119, %120 : vector<8x64xf32>
    %122 = math.tanh %121 : vector<8x64xf32>
    %123 = arith.mulf %118, %122 : vector<8x64xf32>
    %cst_40 = arith.constant dense<0.000000e+00> : vector<8x256xf32>
    %124 = tpu.matmul %123, %14, %cst_40 {dimension_numbers = #tpu.dot_dimension_numbers<[1], [0], [0], [1], [0, 0, 1, 1], [], []>} : vector<8x64xf32>, vector<64x256xf32>, vector<8x256xf32> -> vector<8x256xf32>
    %125 = vector.extract_strided_slice %13 {offsets = [32, 0], sizes = [8, 256], strides = [1, 1]} : vector<64x256xf32> to vector<8x256xf32>
    %126 = arith.addf %124, %125 : vector<8x256xf32>
    %127 = math.tanh %126 : vector<8x256xf32>
    %128 = vector.extract_strided_slice %127 {offsets = [0, 0], sizes = [8, 64], strides = [1, 1]} : vector<8x256xf32> to vector<8x64xf32>
    %cst_41 = arith.constant 5.000000e-01 : f32
    %129 = vector.broadcast %cst_41 : f32 to vector<8x64xf32>
    %130 = arith.mulf %129, %128 : vector<8x64xf32>
    %cst_42 = arith.constant 5.000000e-01 : f32
    %131 = vector.broadcast %cst_42 : f32 to vector<8x64xf32>
    %132 = arith.addf %130, %131 : vector<8x64xf32>
    %133 = vector.extract_strided_slice %127 {offsets = [0, 64], sizes = [8, 64], strides = [1, 1]} : vector<8x256xf32> to vector<8x64xf32>
    %cst_43 = arith.constant 5.000000e-01 : f32
    %134 = vector.broadcast %cst_43 : f32 to vector<8x64xf32>
    %135 = arith.mulf %134, %133 : vector<8x64xf32>
    %cst_44 = arith.constant 5.000000e-01 : f32
    %136 = vector.broadcast %cst_44 : f32 to vector<8x64xf32>
    %137 = arith.addf %135, %136 : vector<8x64xf32>
    %138 = vector.extract_strided_slice %127 {offsets = [0, 128], sizes = [8, 64], strides = [1, 1]} : vector<8x256xf32> to vector<8x64xf32>
    %139 = vector.extract_strided_slice %127 {offsets = [0, 192], sizes = [8, 64], strides = [1, 1]} : vector<8x256xf32> to vector<8x64xf32>
    %cst_45 = arith.constant 5.000000e-01 : f32
    %140 = vector.broadcast %cst_45 : f32 to vector<8x64xf32>
    %141 = arith.mulf %140, %139 : vector<8x64xf32>
    %cst_46 = arith.constant 5.000000e-01 : f32
    %142 = vector.broadcast %cst_46 : f32 to vector<8x64xf32>
    %143 = arith.addf %141, %142 : vector<8x64xf32>
    %144 = arith.mulf %137, %121 : vector<8x64xf32>
    %145 = arith.mulf %132, %138 : vector<8x64xf32>
    %146 = arith.addf %144, %145 : vector<8x64xf32>
    %147 = math.tanh %146 : vector<8x64xf32>
    %148 = arith.mulf %143, %147 : vector<8x64xf32>
    %cst_47 = arith.constant dense<0.000000e+00> : vector<8x256xf32>
    %149 = tpu.matmul %148, %14, %cst_47 {dimension_numbers = #tpu.dot_dimension_numbers<[1], [0], [0], [1], [0, 0, 1, 1], [], []>} : vector<8x64xf32>, vector<64x256xf32>, vector<8x256xf32> -> vector<8x256xf32>
    %150 = vector.extract_strided_slice %13 {offsets = [40, 0], sizes = [8, 256], strides = [1, 1]} : vector<64x256xf32> to vector<8x256xf32>
    %151 = arith.addf %149, %150 : vector<8x256xf32>
    %152 = math.tanh %151 : vector<8x256xf32>
    %153 = vector.extract_strided_slice %152 {offsets = [0, 0], sizes = [8, 64], strides = [1, 1]} : vector<8x256xf32> to vector<8x64xf32>
    %cst_48 = arith.constant 5.000000e-01 : f32
    %154 = vector.broadcast %cst_48 : f32 to vector<8x64xf32>
    %155 = arith.mulf %154, %153 : vector<8x64xf32>
    %cst_49 = arith.constant 5.000000e-01 : f32
    %156 = vector.broadcast %cst_49 : f32 to vector<8x64xf32>
    %157 = arith.addf %155, %156 : vector<8x64xf32>
    %158 = vector.extract_strided_slice %152 {offsets = [0, 64], sizes = [8, 64], strides = [1, 1]} : vector<8x256xf32> to vector<8x64xf32>
    %cst_50 = arith.constant 5.000000e-01 : f32
    %159 = vector.broadcast %cst_50 : f32 to vector<8x64xf32>
    %160 = arith.mulf %159, %158 : vector<8x64xf32>
    %cst_51 = arith.constant 5.000000e-01 : f32
    %161 = vector.broadcast %cst_51 : f32 to vector<8x64xf32>
    %162 = arith.addf %160, %161 : vector<8x64xf32>
    %163 = vector.extract_strided_slice %152 {offsets = [0, 128], sizes = [8, 64], strides = [1, 1]} : vector<8x256xf32> to vector<8x64xf32>
    %164 = vector.extract_strided_slice %152 {offsets = [0, 192], sizes = [8, 64], strides = [1, 1]} : vector<8x256xf32> to vector<8x64xf32>
    %cst_52 = arith.constant 5.000000e-01 : f32
    %165 = vector.broadcast %cst_52 : f32 to vector<8x64xf32>
    %166 = arith.mulf %165, %164 : vector<8x64xf32>
    %cst_53 = arith.constant 5.000000e-01 : f32
    %167 = vector.broadcast %cst_53 : f32 to vector<8x64xf32>
    %168 = arith.addf %166, %167 : vector<8x64xf32>
    %169 = arith.mulf %162, %146 : vector<8x64xf32>
    %170 = arith.mulf %157, %163 : vector<8x64xf32>
    %171 = arith.addf %169, %170 : vector<8x64xf32>
    %172 = math.tanh %171 : vector<8x64xf32>
    %173 = arith.mulf %168, %172 : vector<8x64xf32>
    %cst_54 = arith.constant dense<0.000000e+00> : vector<8x256xf32>
    %174 = tpu.matmul %173, %14, %cst_54 {dimension_numbers = #tpu.dot_dimension_numbers<[1], [0], [0], [1], [0, 0, 1, 1], [], []>} : vector<8x64xf32>, vector<64x256xf32>, vector<8x256xf32> -> vector<8x256xf32>
    %175 = vector.extract_strided_slice %13 {offsets = [48, 0], sizes = [8, 256], strides = [1, 1]} : vector<64x256xf32> to vector<8x256xf32>
    %176 = arith.addf %174, %175 : vector<8x256xf32>
    %177 = math.tanh %176 : vector<8x256xf32>
    %178 = vector.extract_strided_slice %177 {offsets = [0, 0], sizes = [8, 64], strides = [1, 1]} : vector<8x256xf32> to vector<8x64xf32>
    %cst_55 = arith.constant 5.000000e-01 : f32
    %179 = vector.broadcast %cst_55 : f32 to vector<8x64xf32>
    %180 = arith.mulf %179, %178 : vector<8x64xf32>
    %cst_56 = arith.constant 5.000000e-01 : f32
    %181 = vector.broadcast %cst_56 : f32 to vector<8x64xf32>
    %182 = arith.addf %180, %181 : vector<8x64xf32>
    %183 = vector.extract_strided_slice %177 {offsets = [0, 64], sizes = [8, 64], strides = [1, 1]} : vector<8x256xf32> to vector<8x64xf32>
    %cst_57 = arith.constant 5.000000e-01 : f32
    %184 = vector.broadcast %cst_57 : f32 to vector<8x64xf32>
    %185 = arith.mulf %184, %183 : vector<8x64xf32>
    %cst_58 = arith.constant 5.000000e-01 : f32
    %186 = vector.broadcast %cst_58 : f32 to vector<8x64xf32>
    %187 = arith.addf %185, %186 : vector<8x64xf32>
    %188 = vector.extract_strided_slice %177 {offsets = [0, 128], sizes = [8, 64], strides = [1, 1]} : vector<8x256xf32> to vector<8x64xf32>
    %189 = vector.extract_strided_slice %177 {offsets = [0, 192], sizes = [8, 64], strides = [1, 1]} : vector<8x256xf32> to vector<8x64xf32>
    %cst_59 = arith.constant 5.000000e-01 : f32
    %190 = vector.broadcast %cst_59 : f32 to vector<8x64xf32>
    %191 = arith.mulf %190, %189 : vector<8x64xf32>
    %cst_60 = arith.constant 5.000000e-01 : f32
    %192 = vector.broadcast %cst_60 : f32 to vector<8x64xf32>
    %193 = arith.addf %191, %192 : vector<8x64xf32>
    %194 = arith.mulf %187, %171 : vector<8x64xf32>
    %195 = arith.mulf %182, %188 : vector<8x64xf32>
    %196 = arith.addf %194, %195 : vector<8x64xf32>
    %197 = math.tanh %196 : vector<8x64xf32>
    %198 = arith.mulf %193, %197 : vector<8x64xf32>
    %cst_61 = arith.constant dense<0.000000e+00> : vector<8x256xf32>
    %199 = tpu.matmul %198, %14, %cst_61 {dimension_numbers = #tpu.dot_dimension_numbers<[1], [0], [0], [1], [0, 0, 1, 1], [], []>} : vector<8x64xf32>, vector<64x256xf32>, vector<8x256xf32> -> vector<8x256xf32>
    %200 = vector.extract_strided_slice %13 {offsets = [56, 0], sizes = [8, 256], strides = [1, 1]} : vector<64x256xf32> to vector<8x256xf32>
    %201 = arith.addf %199, %200 : vector<8x256xf32>
    %202 = math.tanh %201 : vector<8x256xf32>
    %203 = vector.extract_strided_slice %202 {offsets = [0, 0], sizes = [8, 64], strides = [1, 1]} : vector<8x256xf32> to vector<8x64xf32>
    %cst_62 = arith.constant 5.000000e-01 : f32
    %204 = vector.broadcast %cst_62 : f32 to vector<8x64xf32>
    %205 = arith.mulf %204, %203 : vector<8x64xf32>
    %cst_63 = arith.constant 5.000000e-01 : f32
    %206 = vector.broadcast %cst_63 : f32 to vector<8x64xf32>
    %207 = arith.addf %205, %206 : vector<8x64xf32>
    %208 = vector.extract_strided_slice %202 {offsets = [0, 64], sizes = [8, 64], strides = [1, 1]} : vector<8x256xf32> to vector<8x64xf32>
    %cst_64 = arith.constant 5.000000e-01 : f32
    %209 = vector.broadcast %cst_64 : f32 to vector<8x64xf32>
    %210 = arith.mulf %209, %208 : vector<8x64xf32>
    %cst_65 = arith.constant 5.000000e-01 : f32
    %211 = vector.broadcast %cst_65 : f32 to vector<8x64xf32>
    %212 = arith.addf %210, %211 : vector<8x64xf32>
    %213 = vector.extract_strided_slice %202 {offsets = [0, 128], sizes = [8, 64], strides = [1, 1]} : vector<8x256xf32> to vector<8x64xf32>
    %214 = vector.extract_strided_slice %202 {offsets = [0, 192], sizes = [8, 64], strides = [1, 1]} : vector<8x256xf32> to vector<8x64xf32>
    %cst_66 = arith.constant 5.000000e-01 : f32
    %215 = vector.broadcast %cst_66 : f32 to vector<8x64xf32>
    %216 = arith.mulf %215, %214 : vector<8x64xf32>
    %cst_67 = arith.constant 5.000000e-01 : f32
    %217 = vector.broadcast %cst_67 : f32 to vector<8x64xf32>
    %218 = arith.addf %216, %217 : vector<8x64xf32>
    %219 = arith.mulf %212, %196 : vector<8x64xf32>
    %220 = arith.mulf %207, %213 : vector<8x64xf32>
    %221 = arith.addf %219, %220 : vector<8x64xf32>
    %222 = math.tanh %221 : vector<8x64xf32>
    %223 = arith.mulf %218, %222 : vector<8x64xf32>
    %224 = vector.extract_strided_slice %223 {offsets = [0, 0], sizes = [8, 32], strides = [1, 1]} : vector<8x64xf32> to vector<8x32xf32>
    %225 = vector.extract_strided_slice %221 {offsets = [0, 0], sizes = [8, 32], strides = [1, 1]} : vector<8x64xf32> to vector<8x32xf32>
    %cst_68 = arith.constant dense<0.000000e+00> : vector<8x256xf32>
    %226 = tpu.matmul %223, %14, %cst_68 {dimension_numbers = #tpu.dot_dimension_numbers<[1], [0], [0], [1], [0, 0, 1, 1], [], []>} : vector<8x64xf32>, vector<64x256xf32>, vector<8x256xf32> -> vector<8x256xf32>
    %227 = vector.broadcast %15 : vector<1x256xf32> to vector<8x256xf32>
    %228 = arith.addf %226, %227 : vector<8x256xf32>
    %229 = math.tanh %228 : vector<8x256xf32>
    %230 = vector.extract_strided_slice %229 {offsets = [0, 0], sizes = [8, 64], strides = [1, 1]} : vector<8x256xf32> to vector<8x64xf32>
    %cst_69 = arith.constant 5.000000e-01 : f32
    %231 = vector.broadcast %cst_69 : f32 to vector<8x64xf32>
    %232 = arith.mulf %231, %230 : vector<8x64xf32>
    %cst_70 = arith.constant 5.000000e-01 : f32
    %233 = vector.broadcast %cst_70 : f32 to vector<8x64xf32>
    %234 = arith.addf %232, %233 : vector<8x64xf32>
    %235 = vector.extract_strided_slice %229 {offsets = [0, 64], sizes = [8, 64], strides = [1, 1]} : vector<8x256xf32> to vector<8x64xf32>
    %cst_71 = arith.constant 5.000000e-01 : f32
    %236 = vector.broadcast %cst_71 : f32 to vector<8x64xf32>
    %237 = arith.mulf %236, %235 : vector<8x64xf32>
    %cst_72 = arith.constant 5.000000e-01 : f32
    %238 = vector.broadcast %cst_72 : f32 to vector<8x64xf32>
    %239 = arith.addf %237, %238 : vector<8x64xf32>
    %240 = vector.extract_strided_slice %229 {offsets = [0, 128], sizes = [8, 64], strides = [1, 1]} : vector<8x256xf32> to vector<8x64xf32>
    %241 = vector.extract_strided_slice %229 {offsets = [0, 192], sizes = [8, 64], strides = [1, 1]} : vector<8x256xf32> to vector<8x64xf32>
    %cst_73 = arith.constant 5.000000e-01 : f32
    %242 = vector.broadcast %cst_73 : f32 to vector<8x64xf32>
    %243 = arith.mulf %242, %241 : vector<8x64xf32>
    %cst_74 = arith.constant 5.000000e-01 : f32
    %244 = vector.broadcast %cst_74 : f32 to vector<8x64xf32>
    %245 = arith.addf %243, %244 : vector<8x64xf32>
    %246 = arith.mulf %239, %221 : vector<8x64xf32>
    %247 = arith.mulf %234, %240 : vector<8x64xf32>
    %248 = arith.addf %246, %247 : vector<8x64xf32>
    %249 = math.tanh %248 : vector<8x64xf32>
    %250 = arith.mulf %245, %249 : vector<8x64xf32>
    %251 = vector.extract_strided_slice %250 {offsets = [0, 32], sizes = [8, 32], strides = [1, 1]} : vector<8x64xf32> to vector<8x32xf32>
    %252 = vector.extract_strided_slice %248 {offsets = [0, 32], sizes = [8, 32], strides = [1, 1]} : vector<8x64xf32> to vector<8x32xf32>
    %253 = tpu.concatenate %224, %225, %251, %252 in 1 : vector<8x32xf32>, vector<8x32xf32>, vector<8x32xf32>, vector<8x32xf32> -> vector<8x128xf32>
    %254 = math.tanh %253 : vector<8x128xf32>
    %c0_75 = arith.constant 0 : index
    %c0_76 = arith.constant 0 : index
    %255 = vector.load %arg5[%c0_75, %c0_76] : memref<128x32xf32, #tpu.memory_space<vmem>>, vector<128x32xf32>
    %cst_77 = arith.constant dense<0.000000e+00> : vector<8x32xf32>
    %256 = tpu.matmul %254, %255, %cst_77 {dimension_numbers = #tpu.dot_dimension_numbers<[1], [0], [0], [1], [0, 0, 1, 1], [], []>} : vector<8x128xf32>, vector<128x32xf32>, vector<8x32xf32> -> vector<8x32xf32>
    %c0_78 = arith.constant 0 : index
    %c0_79 = arith.constant 0 : index
    %257 = vector.load %arg6[%c0_78, %c0_79] : memref<1x32xf32, #tpu.memory_space<vmem>>, vector<1x32xf32>
    %258 = vector.broadcast %257 : vector<1x32xf32> to vector<8x32xf32>
    %259 = arith.addf %256, %258 : vector<8x32xf32>
    %260 = vector.extract_strided_slice %259 {offsets = [0, 0], sizes = [2, 32], strides = [1, 1]} : vector<8x32xf32> to vector<2x32xf32>
    %c0_80 = arith.constant 0 : index
    %c0_81 = arith.constant 0 : index
    %261 = vector.load %arg7[%c0_80, %c0_81] : memref<2x32xf32, #tpu.memory_space<vmem>>, vector<2x32xf32>
    tpu.vector_store %arg7[%c0_80, %c0_81], %260 {strides = array<i32>} : memref<2x32xf32, #tpu.memory_space<vmem>>, vector<2x32xf32>,
    return
  }
}

</mosaic_0001>

<bundles_post_ra>
// kernel: tpu_custom_call.1
= control target key start
LH: loop header
LB: loop body
LE: loop exit
PB: predicated region body
PF: predicated region fallthrough
CT: control target
= control target key end

     0   :  { %v1721_v2 = vmov 0   ;;  %v1722_v10 = vmov 0.0   ;;  %s2154_s0 = inlined_call_operand.vmem [shape: s32[64,1], index: 0, kind: input, shape index: {}]   ;;  %s2155_s1 = inlined_call_operand.vmem [shape: f32[50,32], index: 1, kind: input, shape index: {}]   ;;  %s2156_s2 = inlined_call_operand.vmem [shape: f32[32,256], index: 2, kind: input, shape index: {}]   ;;  %s2157_s3 = inlined_call_operand.vmem [shape: f32[64,256], index: 3, kind: input, shape index: {}]   ;;  %s2158_s4 = inlined_call_operand.vmem [shape: f32[1,256], index: 4, kind: input, shape index: {}]   ;;  %s2159_s5 = inlined_call_operand.vmem [shape: f32[128,32], index: 5, kind: input, shape index: {}]   ;;  %s2160_s6 = inlined_call_operand.vmem [shape: f32[1,32], index: 6, kind: input, shape index: {}]   ;;  %s2161_s7 = inlined_call_operand.hbm [shape: f32[2,32], index: 7, kind: output, shape index: {}]  }
   0x1   :  { %v27_v0 = vld [vmem:[%s2154_s0] sm:$0xff]  ;;  %v29_v1 = vld [vmem:[%s2154_s0 + $0x10] sm:$0xff]  ;;  %1623 = vset.pattern.permute.xlu0 %v1721_v2  ;;  %1624 = vset.pattern.permute.xlu1 %v1721_v2  ;;  %v28_v3 = vld [vmem:[%s2154_s0 + $0x8] sm:$0xff] }
   0x2   :  { %38 = vperm.xlu0 %1623, %v27_v0   ;;  %44 = vperm.xlu1 %1624, %v29_v1   ;;  %v85_v4 = vld [vmem:[%s2155_s1] sm:$0xff]  ;;  %v86_v5 = vld [vmem:[%s2155_s1 + $0x8] sm:$0xff]  ;;  %v30_v6 = vld [vmem:[%s2154_s0 + $0x18] sm:$0xff] }
   0x3   :  { %v1412_v7 = vpack.c.bf16 %v86_v5, %v85_v4  ;;  %v87_v8 = vld [vmem:[%s2155_s1 + $0x10] sm:$0xff]  ;;  %v88_v9 = vld [vmem:[%s2155_s1 + $0x18] sm:$0xff]  ;;  %367 = vmatprep.mubr.f32.mxu1 %v1722_v10 }
   0x4   :  { %v1416_v11 = vpack.c.bf16 %v88_v9, %v87_v8 }
   0x5   :  { %12 = vsyncpa [#allocation3], 0  ;;  %1413 = vmatprep.subr.bf16.mxu0 %v1412_v7  ;;  %v89_v12 = vld [vmem:[%s2155_s1 + $0x20] sm:$0xff]  ;;  %v90_v13 = vld [vmem:[%s2155_s1 + $0x28] sm:$0xff]  ;;  %vm117_vm0 = vcmask 1041408   ;;  %v35_v26 = vlaneseq  ;;  %vm92_vm1 = vcmask 408576  }
   0x6   :  { %41 = vperm.xlu0 %1623, %v28_v3   ;;  %47 = vperm.xlu1 %1624, %v30_v6   ;;  %v31_v14 = vld [vmem:[%s2154_s0 + $0x20] sm:$0xff]  ;;  %v32_v15 = vld [vmem:[%s2154_s0 + $0x28] sm:$0xff]  ;;  %v1420_v16 = vpack.c.bf16 %v90_v13, %v89_v12  ;;  %v33_v17 = vld [vmem:[%s2154_s0 + $0x30] sm:$0xff]  ;;  %vm254_vm10 = vcmask 261120   ;;  %vm435_vm12 = vcmask 523264   ;;  %vm1726_vm13 = vmmov 0  }
   0x7   :  { %1415 = vmatpush3.bf16.msra.mxu0 %v1412_v7  ;;  %v91_v18 = vld [vmem:[%s2155_s1 + $0x30] sm:$0x3]  ;;  %v34_v19 = vld [vmem:[%s2154_s0 + $0x38] sm:$0xff]  ;;  %v235_v20 = vld [vmem:[%s2156_s2 + $0x8] sm:$0xff]  ;;  %v1827_v27 = vand.u32 127, %v35_v26  ;;  %v245_v3 = vshrl.u32 %v35_v26, 7 }
   0x8   :  { %1417 = vmatprep.subr.bf16.mxu0 %v1416_v11  ;;  %v237_v21 = vld [vmem:[%s2156_s2 + $0x18] sm:$0xff]  ;;  %v234_v22 = vld [vmem:[%s2156_s2] sm:$0xff]  ;;  %v236_v24 = vld [vmem:[%s2156_s2 + $0x10] sm:$0xff]  ;;  %vm1172_vm14 = vcmask 785408   ;;  %s1727_s12 = smov [#allocation2]   ;;  %vm1268_vm15 = vcmask 254976  }
   0x9   :  { %v1424_v23 = vpack.c.bf16 %v237_v21, %v235_v20  ;;  %v1426_v25 = vpack.c.bf16 %v236_v24, %v234_v22  ;;  %v239_v44 = vld [vmem:[%s2156_s2 + $0x28] sm:$0xff]  ;;  %v241_v45 = vld [vmem:[%s2156_s2 + $0x38] sm:$0xff]  ;;  %v238_v46 = vld [vmem:[%s2156_s2 + $0x20] sm:$0xff]  ;;  %vm423_vm11 = vcmp.lt.s32.totalorder %v1827_v27, 32  ;;  %v246_v4 = vsub.s32 0, %v245_v3  ;;  %s1276_s1 = sshll.u32 %s1727_s12, 4  ;;  %s1277_s1 = int_to_ptr.vmem [resolvable:$true] %s1276_s1 }
   0xa   :  { %50 = vperm.xlu0 %1623, %v31_v14   ;;  %53 = vperm.xlu1 %1624, %v32_v15   ;;  %v1428_v47 = vpack.c.bf16 %v241_v45, %v239_v44  ;;  %v240_v48 = vld [vmem:[%s2156_s2 + $0x30] sm:$0xff]  ;;  %v1309_v2 = vsel %vm423_vm11, 1.0, %v1722_v10  ;;  %s1723_s2 = smov 64   ;;  %v242_v5 = vld [vmem:[%s2158_s4] sm:$0x3]  ;;  %v250_v6 = vsub.s32 1, %v245_v3  ;;  %p1702_p1 = scmp.lt.s32.totalorder %s1277_s1, %s1277_s1 }
   0xb   :  { %1419 = vmatpush3.bf16.msra.mxu0 %v1416_v11  ;;  %1584 = vmatprep.subr.bf16.mxu1 %v1424_v23  ;;  %v1430_v49 = vpack.c.bf16 %v240_v48, %v238_v46  ;;  %v1889_v7 = vrot.slane %v242_v5, %v246_v4  ;;  %v393_v20 = vld [vmem:[%s2157_s3 + $0x8] sm:$0xff]  ;;  %v395_v21 = vld [vmem:[%s2157_s3 + $0x18] sm:$0xff]  ;;  %v392_v22 = vld [vmem:[%s2157_s3] sm:$0xff] }
   0xc   :  { %1421 = vmatprep.subr.bf16.mxu0 %v1420_v16  ;;  %1586 = vmatpush1.bf16.msra.mxu1 %v1426_v25  ;;  %v1891_v8 = vrot.slane %v242_v5, %v250_v6  ;;  %v1909_v24 = vpack.c.bf16 %v395_v21, %v393_v20  ;;  %v397_v26 = vld [vmem:[%s2157_s3 + $0x28] sm:$0xff]  ;;  %v404_v44 = vld [vmem:[%s2157_s3 + $0x60] sm:$0xff]  ;;  %v406_v45 = vld [vmem:[%s2157_s3 + $0x70] sm:$0xff] }
   0xd   :  { %1585 = vmatprep.subr.bf16.mxu1 %v1428_v47  ;;  %v1977_v46 = vpack.c.bf16 %v406_v45, %v404_v44 }
   0xe   :  { %56 = vperm.xlu0 %1623, %v33_v17   ;;  %59 = vperm.xlu1 %1624, %v34_v19  }
   0xf   :  { %1423 = vmatpush3.bf16.msra.mxu0 %v1420_v16 }
  0x10   :  { %1363 = vmatprep.subr.msk.mxu0 %vm117_vm0, %v91_v18  ;;  %1587 = vmatpush1.bf16.msra.mxu1 %v1430_v49 }
  0x11   :  { %1449 = vmatprep.subr.bf16.mxu1 %v1909_v24 }
  0x12   :  { %427 = vrot.lane.b32.xlu1 %v1309_v2, %s1723_s2 }
  0x13   :  { %1364 = vmatpush3.msk.msra.mxu0 %vm117_vm0, %v91_v18 }
  0x14   :  { %1425 = vmatprep.subr.bf16.mxu0 %v1424_v23 }
  0x81   :  { %v39_v28 = vpop.permute.xlu0 %38  ;;  %v45_v29 = vpop.permute.xlu1 %44 }
  0x82   :  { %vm61_vm2 = vcmp.eq.s32.totalorder %v1827_v27, %v39_v28  ;;  %vm63_vm3 = vcmp.eq.s32.totalorder %v1827_v27, %v45_v29 }
  0x83   :  { %v1284_v30 = vsel %vm61_vm2, 1.0, %v1722_v10  ;;  %v1286_v33 = vsel %vm63_vm3, 1.0, %v1722_v10 }
  0x84   :  { %1365 = vmatprep.mubr.msk.f32.mxu0 %vm92_vm1, %v1284_v30 }
  0x85   :  { %v42_v31 = vpop.permute.xlu0 %41  ;;  %v48_v32 = vpop.permute.xlu1 %47 }
  0x86   :  { %vm62_vm4 = vcmp.eq.s32.totalorder %v1827_v27, %v42_v31  ;;  %vm64_vm5 = vcmp.eq.s32.totalorder %v1827_v27, %v48_v32  ;;  %v396_v31 = vld [vmem:[%s2157_s3 + $0x20] sm:$0xff]  ;;  %v398_v32 = vld [vmem:[%s2157_s3 + $0x30] sm:$0xff] }
  0x87   :  { %v1285_v34 = vsel %vm62_vm4, 1.0, %v1722_v10  ;;  %v1287_v35 = vsel %vm64_vm5, 1.0, %v1722_v10 }
  0x88   :  { %1366 = vmatmul.mubr.msk.f32.vlgmr.msra.gmra.mrb[0].mxu0 %vm92_vm1, %v1285_v34 }
  0x89   :  { %v51_v36 = vpop.permute.xlu0 %50  ;;  %1368 = vmatprep.mubr.msk.f32.mxu0 %vm92_vm1, %v1286_v33  ;;  %v54_v37 = vpop.permute.xlu1 %53  ;;  %1427 = vmatpush1.bf16.msra.mxu0 %v1426_v25  ;;  %v394_v25 = vld [vmem:[%s2157_s3 + $0x10] sm:$0xff]  ;;  %v401_v33 = vld [vmem:[%s2157_s3 + $0x48] sm:$0xff] }
  0x8a   :  { %vm65_vm6 = vcmp.eq.s32.totalorder %v1827_v27, %v51_v36  ;;  %vm66_vm7 = vcmp.eq.s32.totalorder %v1827_v27, %v54_v37  ;;  %1429 = vmatprep.subr.bf16.mxu0 %v1428_v47  ;;  %v1922_v29 = vpack.c.bf16 %v394_v25, %v392_v22  ;;  %v1943_v36 = vpack.c.bf16 %v398_v32, %v396_v31 }
  0x8b   :  { %v1288_v38 = vsel %vm65_vm6, 1.0, %v1722_v10  ;;  %v1289_v39 = vsel %vm66_vm7, 1.0, %v1722_v10 }
  0x8c   :  { %1369 = vmatmul.mubr.msk.f32.gmra.mrb[2].mxu0 %vm92_vm1, %v1287_v35  ;;  %v403_v35 = vld [vmem:[%s2157_s3 + $0x58] sm:$0xff] }
  0x8d   :  { %1371 = vmatprep.mubr.msk.f32.mxu0 %vm92_vm1, %v1288_v38  ;;  %v57_v40 = vpop.permute.xlu0 %56  ;;  %v60_v42 = vpop.permute.xlu1 %59  ;;  %1431 = vmatpush1.bf16.msra.mxu0 %v1430_v49  ;;  %v1947_v37 = vpack.c.bf16 %v403_v35, %v401_v33  ;;  %v400_v38 = vld [vmem:[%s2157_s3 + $0x40] sm:$0xff] }
  0x8e   :  { %vm67_vm8 = vcmp.eq.s32.totalorder %v1827_v27, %v57_v40  ;;  %vm68_vm9 = vcmp.eq.s32.totalorder %v1827_v27, %v60_v42  ;;  %v399_v27 = vld [vmem:[%s2157_s3 + $0x38] sm:$0xff]  ;;  %1433 = vmatprep.subr.bf16.mxu0 %v1909_v24  ;;  %v405_v40 = vld [vmem:[%s2157_s3 + $0x68] sm:$0xff] }
  0x8f   :  { %v1290_v41 = vsel %vm67_vm8, 1.0, %v1722_v10  ;;  %v1291_v43 = vsel %vm68_vm9, 1.0, %v1722_v10  ;;  %v1924_v30 = vpack.c.bf16 %v399_v27, %v397_v26 }
  0x90   :  { %1372 = vmatmul.mubr.msk.f32.gmra.mrb[4].mxu0 %vm92_vm1, %v1289_v39  ;;  %v402_v39 = vld [vmem:[%s2157_s3 + $0x50] sm:$0xff] }
  0x91   :  { %1374 = vmatprep.mubr.msk.f32.mxu0 %vm92_vm1, %v1290_v41  ;;  %v407_v41 = vld [vmem:[%s2157_s3 + $0x78] sm:$0xff]  ;;  %v1963_v42 = vpack.c.bf16 %v402_v39, %v400_v38  ;;  %s1724_s3 = smov 96  }
  0x94   :  { %1375 = vmatmul.mubr.msk.f32.gmra.mrb[6].mxu0 %vm92_vm1, %v1291_v43  ;;  %v1967_v43 = vpack.c.bf16 %v407_v41, %v405_v40 }
  0x95   :  { %343 = vmatprep.mubr.f32.mxu0 %v1722_v10 }
 0x15b   :  { %v1367_v50 = vpop.f32.mrb[0].mxu0 }
 0x15c   :  { %v187_v51 = vpop.f32.mrb[1].mxu0 }
 0x15d   :  { %1625 = vtanh.f32 %v187_v51 }
 0x15e   :  { %1627 = vtanh.f32 %v1367_v50 }
 0x15f   :  { %v1370_v52 = vpop.f32.mrb[2].mxu0 }
 0x160   :  { %v197_v53 = vpop.f32.mrb[3].mxu0 }
 0x161   :  { %1629 = vtanh.f32 %v197_v53 }
 0x163   :  { %v1373_v54 = vpop.f32.mrb[4].mxu0 }
 0x164   :  { %v207_v55 = vpop.f32.mrb[5].mxu0 }
 0x165   :  { %1631 = vtanh.f32 %v207_v55 }
 0x166   :  { %1633 = vtanh.f32 %v1370_v52 }
 0x167   :  { %v1626_v56 = vpop.eup %1625  ;;  %1635 = vtanh.f32 %v1373_v54  ;;  %v1376_v57 = vpop.f32.mrb[6].mxu0 }
 0x168   :  { %1301 = vmatmul.mubr.msk.f32.vlgmr.msra.gmra.mrb[8].mxu0 %vm254_vm10, %v1626_v56  ;;  %v217_v58 = vpop.f32.mrb[7].mxu0  ;;  %v1628_v59 = vpop.eup %1627 }
 0x169   :  { %349 = vmatprep.mubr.f32.mxu0 %v1722_v10  ;;  %1637 = vtanh.f32 %v217_v58  ;;  %1435 = vmatpush1.bf16.msra.mxu0 %v1922_v29  ;;  %v428_v54 = vpop.permute.xlu1 %427 }
 0x16a   :  { %1639 = vtanh.f32 %v1376_v57  ;;  %1437 = vmatprep.subr.bf16.mxu0 %v1924_v30 }
 0x16b   :  { %v1630_v60 = vpop.eup %1629 }
 0x16c   :  { %1302 = vmatmul.mubr.msk.f32.gmra.mrb[10].mxu0 %vm254_vm10, %v1628_v59 }
 0x16d   :  { %355 = vmatprep.mubr.f32.mxu0 %v1722_v10  ;;  %1439 = vmatpush1.bf16.msra.mxu0 %v1943_v36 }
 0x16e   :  { %1441 = vmatprep.subr.bf16.mxu0 %v1947_v37 }
 0x16f   :  { %v1632_v61 = vpop.eup %1631 }
 0x170   :  { %v1634_v62 = vpop.eup %1633  ;;  %1305 = vmatmul.mubr.msk.f32.vlgmr.msra.gmra.mrb[0].mxu1 %vm254_vm10, %v1632_v61  ;;  %1303 = vmatmul.mubr.msk.f32.gmra.mrb[12].mxu0 %vm254_vm10, %v1630_v60 }
 0x171   :  { %v1636_v63 = vpop.eup %1635  ;;  %373 = vmatprep.mubr.f32.mxu1 %v1722_v10  ;;  %361 = vmatprep.mubr.f32.mxu0 %v1722_v10 }
 0x172   :  { %1451 = vmatpush1.bf16.msra.mxu1 %v1922_v29  ;;  %1443 = vmatpush1.bf16.msra.mxu0 %v1963_v42 }
 0x173   :  { %v1638_v0 = vpop.eup %1637  ;;  %1453 = vmatprep.subr.bf16.mxu1 %v1924_v30  ;;  %1445 = vmatprep.subr.bf16.mxu0 %v1967_v43 }
 0x174   :  { %1306 = vmatmul.mubr.msk.f32.gmra.mrb[2].mxu1 %vm254_vm10, %v1636_v63  ;;  %1304 = vmatmul.mubr.msk.f32.gmra.mrb[14].mxu0 %vm254_vm10, %v1634_v62  ;;  %v1640_v1 = vpop.eup %1639 }
 0x175   :  { %379 = vmatprep.mubr.f32.mxu1 %v1722_v10  ;;  %502 = vmatprep.mubr.f32.mxu0 %v1722_v10 }
 0x176   :  { %1455 = vmatpush1.bf16.msra.mxu1 %v1943_v36  ;;  %1447 = vmatpush1.bf16.msra.mxu0 %v1977_v46 }
 0x177   :  { %1457 = vmatprep.subr.bf16.mxu1 %v1947_v37  ;;  %1545 = vmatprep.subr.bf16.mxu0 %v1909_v24 }
 0x178   :  { %1307 = vmatmul.mubr.msk.f32.gmra.mrb[4].mxu1 %vm254_vm10, %v1638_v0 }
 0x179   :  { %385 = vmatprep.mubr.f32.mxu1 %v1722_v10 }
 0x17a   :  { %1459 = vmatpush1.bf16.msra.mxu1 %v1963_v42 }
 0x17b   :  { %1461 = vmatprep.subr.bf16.mxu1 %v1967_v43 }
 0x17c   :  { %1308 = vmatmul.mubr.msk.f32.gmra.mrb[6].mxu1 %vm254_vm10, %v1640_v1 }
 0x17d   :  { %593 = vmatprep.mubr.f32.mxu1 %v1722_v10 }
 0x17e   :  { %1463 = vmatpush1.bf16.msra.mxu1 %v1977_v46 }
 0x17f   :  { %1465 = vmatprep.subr.bf16.mxu1 %v1909_v24 }
 0x23b   :  { %v345_v9 = vpop.f32.mrb[8].mxu0 }
 0x23c   :  { %v346_v11 = vadd.f32 %v345_v9, %v1889_v7  ;;  %v347_v12 = vpop.f32.mrb[9].mxu0 }
 0x23d   :  { %v348_v13 = vadd.f32 %v347_v12, %v1891_v8 }
 0x23e   :  { %1641 = vtanh.f32 %v346_v11 }
 0x23f   :  { %1643 = vtanh.f32 %v348_v13 }
 0x243   :  { %v1896_v19 = vpop.f32.mrb[12].mxu0 }
 0x244   :  { %v1907_v23 = vpop.f32.mrb[13].mxu0 }
 0x247   :  { %v1920_v28 = vpop.f32.mrb[14].mxu0 }
 0x248   :  { %v1642_v14 = vpop.eup %1641  ;;  %v1935_v34 = vpop.f32.mrb[15].mxu0  ;;  %v364_v40 = vadd.f32 %v1920_v28, %v1889_v7 }
 0x249   :  { %v410_v15 = vmul.f32 0.5, %v1642_v14  ;;  %v1644_v17 = vpop.eup %1643  ;;  %v358_v14 = vadd.f32 %v1896_v19, %v1889_v7  ;;  %v366_v41 = vadd.f32 %v1935_v34, %v1891_v8 }
 0x24a   :  { %v412_v50 = vmul.f32 0.5, %v1644_v17 }
 0x24b   :  { %v411_v16 = vadd.f32 0.5, %v410_v15  ;;  %v360_v15 = vadd.f32 %v1907_v23, %v1891_v8 }
 0x24c   :  { %v413_v51 = vadd.f32 0.5, %v412_v50 }
 0x24d   :  { %v415_v18 = vmul.f32 %v1644_v17, %v411_v16  ;;  %v414_v47 = vmul.f32 0.0, %v411_v16 }
 0x24f   :  { %417 = vrot.lane.b32.xlu0 %v415_v18, %s1723_s2 }
 0x2c1   :  { %v418_v48 = vpop.permute.xlu0 %417 }
 0x2c2   :  { %v420_v49 = vadd.f32 %v418_v48, %v414_v47 }
 0x2c4   :  { %1645 = vtanh.f32 %v420_v49  ;;  %v431_v63 = vmul.f32 %v428_v54, %v420_v49 }
 0x2ce   :  { %v1646_v52 = vpop.eup %1645 }
 0x2cf   :  { %v422_v53 = vmul.f32 %v1646_v52, %v413_v51 }
 0x2d1   :  { %v430_v55 = vmul.f32 %v428_v54, %v422_v53 }
 0x2d3   :  { %433 = vrot.lane.b32.xlu0 %v430_v55, %s1723_s2 }
 0x345   :  { %v434_v56 = vpop.permute.xlu0 %433 }
 0x346   :  { %1310 = vmatmul.mubr.msk.f32.vlgmr.msra.gmra.mrb[10].mxu0 %vm435_vm12, %v434_v56 }
 0x347   :  { %1547 = vmatpush1.bf16.msra.mxu0 %v1922_v29  ;;  %1139 = vmatprep.mubr.f32.mxu0 %v1722_v10 }
 0x348   :  { %1549 = vmatprep.subr.bf16.mxu0 %v1924_v30 }
 0x34b   :  { %1551 = vmatpush1.bf16.msra.mxu0 %v1943_v36 }
 0x34c   :  { %1553 = vmatprep.subr.bf16.mxu0 %v1947_v37 }
 0x34f   :  { %1555 = vmatpush1.bf16.msra.mxu0 %v1963_v42 }
 0x350   :  { %1557 = vmatprep.subr.bf16.mxu0 %v1967_v43 }
 0x353   :  { %1559 = vmatpush1.bf16.msra.mxu0 %v1977_v46 }
 0x419   :  { %v504_v57 = vpop.f32.mrb[10].mxu0 }
 0x41a   :  { %v1588_v58 = vadd.f32 %v504_v57, %v1889_v7  ;;  %v506_v59 = vpop.f32.mrb[11].mxu0 }
 0x41b   :  { %v1589_v60 = vadd.f32 %v506_v59, %v1891_v8 }
 0x41c   :  { %1647 = vtanh.f32 %v1588_v58 }
 0x41d   :  { %1649 = vtanh.f32 %v1589_v60 }
 0x426   :  { %v1648_v61 = vpop.eup %1647 }
 0x427   :  { %v511_v62 = vmul.f32 0.5, %v1648_v61  ;;  %v1650_v1 = vpop.eup %1649 }
 0x428   :  { %v513_v6 = vmul.f32 0.5, %v1650_v1 }
 0x429   :  { %v512_v0 = vadd.f32 0.5, %v511_v62 }
 0x42a   :  { %v514_v9 = vadd.f32 0.5, %v513_v6 }
 0x42b   :  { %v516_v2 = vmul.f32 %v1650_v1, %v512_v0  ;;  %v515_v3 = vmul.f32 %v512_v0, %v431_v63 }
 0x42d   :  { %518 = vrot.lane.b32.xlu1 %v516_v2, %s1723_s2 }
 0x49f   :  { %v519_v4 = vpop.permute.xlu1 %518 }
 0x4a0   :  { %v521_v5 = vadd.f32 %v519_v4, %v515_v3 }
 0x4a2   :  { %1651 = vtanh.f32 %v521_v5 }
 0x4ac   :  { %v1652_v11 = vpop.eup %1651 }
 0x4ad   :  { %v523_v12 = vmul.f32 %v1652_v11, %v514_v9 }
 0x4af   :  { %525 = vrot.lane.b32.xlu0 %v523_v12, %s1723_s2 }
 0x521   :  { %v526_v13 = vpop.permute.xlu0 %525 }
 0x522   :  { %1311 = vmatmul.mubr.msk.f32.vlgmr.msra.gmra.mrb[8].mxu1 %vm435_vm12, %v526_v13 }
 0x523   :  { %1467 = vmatpush1.bf16.msra.mxu1 %v1922_v29  ;;  %684 = vmatprep.mubr.f32.mxu1 %v1722_v10 }
 0x524   :  { %1469 = vmatprep.subr.bf16.mxu1 %v1924_v30 }
 0x527   :  { %1471 = vmatpush1.bf16.msra.mxu1 %v1943_v36 }
 0x528   :  { %1473 = vmatprep.subr.bf16.mxu1 %v1947_v37 }
 0x52b   :  { %1475 = vmatpush1.bf16.msra.mxu1 %v1963_v42 }
 0x52c   :  { %1477 = vmatprep.subr.bf16.mxu1 %v1967_v43 }
 0x52f   :  { %1479 = vmatpush1.bf16.msra.mxu1 %v1977_v46 }
 0x530   :  { %1481 = vmatprep.subr.bf16.mxu1 %v1909_v24 }
 0x5f5   :  { %v595_v16 = vpop.f32.mrb[8].mxu1 }
 0x5f6   :  { %v596_v17 = vadd.f32 %v595_v16, %v358_v14  ;;  %v597_v18 = vpop.f32.mrb[9].mxu1 }
 0x5f7   :  { %v598_v20 = vadd.f32 %v597_v18, %v360_v15 }
 0x5f8   :  { %1653 = vtanh.f32 %v596_v17 }
 0x5f9   :  { %1655 = vtanh.f32 %v598_v20 }
 0x602   :  { %v1654_v21 = vpop.eup %1653 }
 0x603   :  { %v602_v22 = vmul.f32 0.5, %v1654_v21  ;;  %v1656_v26 = vpop.eup %1655 }
 0x604   :  { %v604_v19 = vmul.f32 0.5, %v1656_v26 }
 0x605   :  { %v603_v25 = vadd.f32 0.5, %v602_v22 }
 0x606   :  { %v605_v35 = vadd.f32 0.5, %v604_v19 }
 0x607   :  { %v607_v27 = vmul.f32 %v1656_v26, %v603_v25  ;;  %v606_v31 = vmul.f32 %v603_v25, %v521_v5 }
 0x609   :  { %609 = vrot.lane.b32.xlu1 %v607_v27, %s1723_s2 }
 0x67b   :  { %v610_v32 = vpop.permute.xlu1 %609 }
 0x67c   :  { %v612_v33 = vadd.f32 %v610_v32, %v606_v31 }
 0x67e   :  { %1657 = vtanh.f32 %v612_v33 }
 0x688   :  { %v1658_v23 = vpop.eup %1657 }
 0x689   :  { %v614_v38 = vmul.f32 %v1658_v23, %v605_v35 }
 0x68b   :  { %616 = vrot.lane.b32.xlu0 %v614_v38, %s1723_s2 }
 0x6fd   :  { %v617_v39 = vpop.permute.xlu0 %616 }
 0x6fe   :  { %1312 = vmatmul.mubr.msk.f32.vlgmr.msra.gmra.mrb[10].mxu1 %vm435_vm12, %v617_v39 }
 0x6ff   :  { %1483 = vmatpush1.bf16.msra.mxu1 %v1922_v29  ;;  %775 = vmatprep.mubr.f32.mxu1 %v1722_v10 }
 0x700   :  { %1485 = vmatprep.subr.bf16.mxu1 %v1924_v30 }
 0x703   :  { %1487 = vmatpush1.bf16.msra.mxu1 %v1943_v36 }
 0x704   :  { %1489 = vmatprep.subr.bf16.mxu1 %v1947_v37 }
 0x707   :  { %1491 = vmatpush1.bf16.msra.mxu1 %v1963_v42 }
 0x708   :  { %1493 = vmatprep.subr.bf16.mxu1 %v1967_v43 }
 0x70b   :  { %1495 = vmatpush1.bf16.msra.mxu1 %v1977_v46 }
 0x70c   :  { %1497 = vmatprep.subr.bf16.mxu1 %v1909_v24 }
 0x7d1   :  { %v686_v44 = vpop.f32.mrb[10].mxu1 }
 0x7d2   :  { %v687_v45 = vadd.f32 %v686_v44, %v364_v40  ;;  %v688_v47 = vpop.f32.mrb[11].mxu1 }
 0x7d3   :  { %v689_v48 = vadd.f32 %v688_v47, %v366_v41 }
 0x7d4   :  { %1659 = vtanh.f32 %v687_v45 }
 0x7d5   :  { %1661 = vtanh.f32 %v689_v48 }
 0x7de   :  { %v1660_v49 = vpop.eup %1659 }
 0x7df   :  { %v693_v50 = vmul.f32 0.5, %v1660_v49  ;;  %v1662_v52 = vpop.eup %1661 }
 0x7e0   :  { %v695_v28 = vmul.f32 0.5, %v1662_v52 }
 0x7e1   :  { %v694_v51 = vadd.f32 0.5, %v693_v50 }
 0x7e2   :  { %v696_v57 = vadd.f32 0.5, %v695_v28 }
 0x7e3   :  { %v698_v53 = vmul.f32 %v1662_v52, %v694_v51  ;;  %v697_v54 = vmul.f32 %v694_v51, %v612_v33 }
 0x7e5   :  { %700 = vrot.lane.b32.xlu1 %v698_v53, %s1723_s2 }
 0x857   :  { %v701_v55 = vpop.permute.xlu1 %700 }
 0x858   :  { %v703_v56 = vadd.f32 %v701_v55, %v697_v54 }
 0x85a   :  { %1663 = vtanh.f32 %v703_v56 }
 0x864   :  { %v1664_v34 = vpop.eup %1663 }
 0x865   :  { %v705_v58 = vmul.f32 %v1664_v34, %v696_v57 }
 0x867   :  { %707 = vrot.lane.b32.xlu0 %v705_v58, %s1723_s2 }
 0x8d9   :  { %v708_v59 = vpop.permute.xlu0 %707 }
 0x8da   :  { %1313 = vmatmul.mubr.msk.f32.vlgmr.msra.gmra.mrb[0].mxu1 %vm435_vm12, %v708_v59 }
 0x8db   :  { %1499 = vmatpush1.bf16.msra.mxu1 %v1922_v29  ;;  %866 = vmatprep.mubr.f32.mxu1 %v1722_v10 }
 0x8dc   :  { %1501 = vmatprep.subr.bf16.mxu1 %v1924_v30 }
 0x8df   :  { %1503 = vmatpush1.bf16.msra.mxu1 %v1943_v36 }
 0x8e0   :  { %1505 = vmatprep.subr.bf16.mxu1 %v1947_v37 }
 0x8e3   :  { %1507 = vmatpush1.bf16.msra.mxu1 %v1963_v42 }
 0x8e4   :  { %1509 = vmatprep.subr.bf16.mxu1 %v1967_v43 }
 0x8e7   :  { %1511 = vmatpush1.bf16.msra.mxu1 %v1977_v46 }
 0x8e8   :  { %1513 = vmatprep.subr.bf16.mxu1 %v1909_v24 }
 0x9ad   :  { %v777_v60 = vpop.f32.mrb[0].mxu1 }
 0x9ae   :  { %v1598_v61 = vadd.f32 %v777_v60, %v1889_v7  ;;  %v779_v62 = vpop.f32.mrb[1].mxu1 }
 0x9af   :  { %v1599_v63 = vadd.f32 %v779_v62, %v1891_v8 }
 0x9b0   :  { %1665 = vtanh.f32 %v1598_v61 }
 0x9b1   :  { %1667 = vtanh.f32 %v1599_v63 }
 0x9ba   :  { %v1666_v0 = vpop.eup %1665 }
 0x9bb   :  { %v784_v1 = vmul.f32 0.5, %v1666_v0  ;;  %v1668_v3 = vpop.eup %1667 }
 0x9bc   :  { %v786_v11 = vmul.f32 0.5, %v1668_v3 }
 0x9bd   :  { %v785_v2 = vadd.f32 0.5, %v784_v1 }
 0x9be   :  { %v787_v12 = vadd.f32 0.5, %v786_v11 }
 0x9bf   :  { %v789_v4 = vmul.f32 %v1668_v3, %v785_v2  ;;  %v788_v5 = vmul.f32 %v785_v2, %v703_v56 }
 0x9c1   :  { %791 = vrot.lane.b32.xlu1 %v789_v4, %s1723_s2 }
 0xa33   :  { %v792_v6 = vpop.permute.xlu1 %791 }
 0xa34   :  { %v794_v9 = vadd.f32 %v792_v6, %v788_v5 }
 0xa36   :  { %1669 = vtanh.f32 %v794_v9 }
 0xa40   :  { %v1670_v13 = vpop.eup %1669 }
 0xa41   :  { %v796_v14 = vmul.f32 %v1670_v13, %v787_v12 }
 0xa43   :  { %798 = vrot.lane.b32.xlu0 %v796_v14, %s1723_s2 }
 0xab5   :  { %v799_v15 = vpop.permute.xlu0 %798 }
 0xab6   :  { %1314 = vmatmul.mubr.msk.f32.vlgmr.msra.gmra.mrb[2].mxu1 %vm435_vm12, %v799_v15  ;;  %v1175_v15 = vld [vmem:[%s2159_s5] sm:$0xff] }
 0xab7   :  { %1515 = vmatpush1.bf16.msra.mxu1 %v1922_v29  ;;  %957 = vmatprep.mubr.f32.mxu1 %v1722_v10 }
 0xab8   :  { %1517 = vmatprep.subr.bf16.mxu1 %v1924_v30 }
 0xabb   :  { %1519 = vmatpush1.bf16.msra.mxu1 %v1943_v36 }
 0xabc   :  { %1521 = vmatprep.subr.bf16.mxu1 %v1947_v37 }
 0xabf   :  { %1523 = vmatpush1.bf16.msra.mxu1 %v1963_v42 }
 0xac0   :  { %1525 = vmatprep.subr.bf16.mxu1 %v1967_v43 }
 0xac3   :  { %1527 = vmatpush1.bf16.msra.mxu1 %v1977_v46 }
 0xac4   :  { %1529 = vmatprep.subr.bf16.mxu1 %v1909_v24 }
 0xb89   :  { %v868_v16 = vpop.f32.mrb[2].mxu1 }
 0xb8a   :  { %v1600_v17 = vadd.f32 %v868_v16, %v1889_v7  ;;  %v870_v18 = vpop.f32.mrb[3].mxu1  ;;  %v1725_v16 = vmov 0.0|0.0  }
 0xb8b   :  { %v1601_v20 = vadd.f32 %v870_v18, %v1891_v8  ;;  %1560 = vmatprep.subr.bf16.mxu0 %v1725_v16  ;;  %v1178_v18 = vld [vmem:[%s2159_s5 + $0x18] sm:$0xff] }
 0xb8c   :  { %1671 = vtanh.f32 %v1600_v17 }
 0xb8d   :  { %1673 = vtanh.f32 %v1601_v20 }
 0xb96   :  { %v1672_v21 = vpop.eup %1671 }
 0xb97   :  { %v875_v22 = vmul.f32 0.5, %v1672_v21  ;;  %v1674_v26 = vpop.eup %1673  ;;  %v1179_v21 = vld [vmem:[%s2159_s5 + $0x20] sm:$0xff] }
 0xb98   :  { %v877_v24 = vmul.f32 0.5, %v1674_v26 }
 0xb99   :  { %v876_v25 = vadd.f32 0.5, %v875_v22  ;;  %v1180_v22 = vld [vmem:[%s2159_s5 + $0x28] sm:$0xff] }
 0xb9a   :  { %v878_v19 = vadd.f32 0.5, %v877_v24 }
 0xb9b   :  { %v880_v27 = vmul.f32 %v1674_v26, %v876_v25  ;;  %v879_v31 = vmul.f32 %v876_v25, %v794_v9  ;;  %v1567_v25 = vpack.c.bf16 %v1180_v22, %v1179_v21  ;;  %v1181_v26 = vld [vmem:[%s2159_s5 + $0x30] sm:$0xff] }
 0xb9d   :  { %882 = vrot.lane.b32.xlu1 %v880_v27, %s1723_s2  ;;  %v1182_v27 = vld [vmem:[%s2159_s5 + $0x38] sm:$0xff] }
 0xc0f   :  { %v883_v32 = vpop.permute.xlu1 %882 }
 0xc10   :  { %v885_v33 = vadd.f32 %v883_v32, %v879_v31  ;;  %v1570_v31 = vpack.c.bf16 %v1182_v27, %v1181_v26  ;;  %v1183_v32 = vld [vmem:[%s2159_s5 + $0x40] sm:$0xff] }
 0xc12   :  { %1675 = vtanh.f32 %v885_v33 }
 0xc1c   :  { %v1676_v35 = vpop.eup %1675 }
 0xc1d   :  { %v887_v23 = vmul.f32 %v1676_v35, %v878_v19 }
 0xc1f   :  { %889 = vrot.lane.b32.xlu0 %v887_v23, %s1723_s2 }
 0xc91   :  { %v890_v38 = vpop.permute.xlu0 %889 }
 0xc92   :  { %1315 = vmatmul.mubr.msk.f32.vlgmr.msra.gmra.mrb[4].mxu1 %vm435_vm12, %v890_v38  ;;  %v1185_v38 = vld [vmem:[%s2159_s5 + $0x50] sm:$0xff] }
 0xc93   :  { %1531 = vmatpush1.bf16.msra.mxu1 %v1922_v29  ;;  %1048 = vmatprep.mubr.f32.mxu1 %v1722_v10 }
 0xc94   :  { %1533 = vmatprep.subr.bf16.mxu1 %v1924_v30 }
 0xc97   :  { %1535 = vmatpush1.bf16.msra.mxu1 %v1943_v36 }
 0xc98   :  { %1537 = vmatprep.subr.bf16.mxu1 %v1947_v37 }
 0xc9b   :  { %1539 = vmatpush1.bf16.msra.mxu1 %v1963_v42 }
 0xc9c   :  { %1541 = vmatprep.subr.bf16.mxu1 %v1967_v43 }
 0xc9f   :  { %1543 = vmatpush1.bf16.msra.mxu1 %v1977_v46 }
 0xd65   :  { %v959_v39 = vpop.f32.mrb[4].mxu1 }
 0xd66   :  { %v1602_v40 = vadd.f32 %v959_v39, %v1889_v7  ;;  %v961_v41 = vpop.f32.mrb[5].mxu1  ;;  %v1186_v39 = vld [vmem:[%s2159_s5 + $0x58] sm:$0xff] }
 0xd67   :  { %v1603_v29 = vadd.f32 %v961_v41, %v1891_v8  ;;  %v1187_v41 = vld [vmem:[%s2159_s5 + $0x60] sm:$0xff] }
 0xd68   :  { %1677 = vtanh.f32 %v1602_v40  ;;  %v1576_v40 = vpack.c.bf16 %v1186_v39, %v1185_v38 }
 0xd69   :  { %1679 = vtanh.f32 %v1603_v29  ;;  %v1188_v29 = vld [vmem:[%s2159_s5 + $0x68] sm:$0xff] }
 0xd72   :  { %v1678_v44 = vpop.eup %1677 }
 0xd73   :  { %v966_v30 = vmul.f32 0.5, %v1678_v44  ;;  %v1680_v36 = vpop.eup %1679  ;;  %v1579_v44 = vpack.c.bf16 %v1188_v29, %v1187_v41 }
 0xd74   :  { %v968_v46 = vmul.f32 0.5, %v1680_v36 }
 0xd75   :  { %v967_v45 = vadd.f32 0.5, %v966_v30  ;;  %v1189_v30 = vld [vmem:[%s2159_s5 + $0x70] sm:$0xff] }
 0xd76   :  { %v969_v48 = vadd.f32 0.5, %v968_v46 }
 0xd77   :  { %v971_v47 = vmul.f32 %v1680_v36, %v967_v45  ;;  %v970_v37 = vmul.f32 %v967_v45, %v885_v33  ;;  %v1184_v33 = vld [vmem:[%s2159_s5 + $0x48] sm:$0xff]  ;;  %v1190_v45 = vld [vmem:[%s2159_s5 + $0x78] sm:$0xff] }
 0xd78   :  { %v1573_v24 = vpack.c.bf16 %v1184_v33, %v1183_v32 }
 0xd79   :  { %973 = vrot.lane.b32.xlu1 %v971_v47, %s1723_s2  ;;  %v1582_v47 = vpack.c.bf16 %v1190_v45, %v1189_v30 }
 0xdeb   :  { %v974_v42 = vpop.permute.xlu1 %973 }
 0xdec   :  { %v976_v43 = vadd.f32 %v974_v42, %v970_v37 }
 0xdee   :  { %1681 = vtanh.f32 %v976_v43 }
 0xdf8   :  { %v1682_v49 = vpop.eup %1681 }
 0xdf9   :  { %v978_v50 = vmul.f32 %v1682_v49, %v969_v48 }
 0xdfb   :  { %980 = vrot.lane.b32.xlu0 %v978_v50, %s1723_s2 }
 0xe6d   :  { %v981_v51 = vpop.permute.xlu0 %980 }
 0xe6e   :  { %1316 = vmatmul.mubr.msk.f32.vlgmr.msra.gmra.mrb[6].mxu1 %vm435_vm12, %v981_v51 }
 0xf41   :  { %v1050_v52 = vpop.f32.mrb[6].mxu1 }
 0xf42   :  { %v1604_v53 = vadd.f32 %v1050_v52, %v1889_v7  ;;  %v1052_v54 = vpop.f32.mrb[7].mxu1  ;;  %v1318_v52 = vld [vmem:[%s2160_s6] ss:$0 sm:$0xff] }
 0xf43   :  { %v1605_v55 = vadd.f32 %v1052_v54, %v1891_v8 }
 0xf44   :  { %1683 = vtanh.f32 %v1604_v53 }
 0xf45   :  { %1685 = vtanh.f32 %v1605_v55 }
 0xf4e   :  { %v1684_v56 = vpop.eup %1683 }
 0xf4f   :  { %v1057_v28 = vmul.f32 0.5, %v1684_v56  ;;  %v1686_v34 = vpop.eup %1685 }
 0xf50   :  { %v1059_v62 = vmul.f32 0.5, %v1686_v34 }
 0xf51   :  { %v1058_v57 = vadd.f32 0.5, %v1057_v28 }
 0xf52   :  { %v1060_v63 = vadd.f32 0.5, %v1059_v62 }
 0xf53   :  { %v1062_v58 = vmul.f32 %v1686_v34, %v1058_v57  ;;  %v1061_v59 = vmul.f32 %v1058_v57, %v976_v43 }
 0xf55   :  { %1064 = vrot.lane.b32.xlu1 %v1062_v58, %s1723_s2 }
 0xfc7   :  { %v1065_v60 = vpop.permute.xlu1 %1064 }
 0xfc8   :  { %v1067_v61 = vadd.f32 %v1065_v60, %v1061_v59 }
 0xfca   :  { %1687 = vtanh.f32 %v1067_v61 }
 0xfd4   :  { %v1688_v0 = vpop.eup %1687 }
 0xfd5   :  { %v1069_v1 = vmul.f32 %v1688_v0, %v1060_v63 }
 0xfd7   :  { %1071 = vrot.lane.b32.xlu0 %v1069_v1, %s1723_s2 }
 0xfdb   :  { %1163 = vrot.lane.b32.xlu0 %v1067_v61, %s1724_s3 }
0x1049   :  { %v2079_v2 = vpop.permute.xlu0 %1071 }
0x104a   :  { %1317 = vmatmul.mubr.msk.f32.vlgmr.msra.gmra.mrb[16].mxu0 %vm435_vm12, %v2079_v2 }
0x104b   :  { %1409 = vmatprep.mubr.msk.f32.mxu0 %vm1726_vm13, %v1722_v10 }
0x104d   :  { %v1164_v46 = vpop.permute.xlu0 %1163 }
0x104e   :  { %v1170_v48 = vsel %vm254_vm10, %v2079_v2, %v1164_v46 }
0x111d   :  { %v1141_v3 = vpop.f32.mrb[16].mxu0 }
0x111e   :  { %v1142_v4 = vadd.f32 %v1141_v3, %v1889_v7  ;;  %v1143_v5 = vpop.f32.mrb[17].mxu0  ;;  %v1176_v7 = vld [vmem:[%s2159_s5 + $0x8] sm:$0xff] }
0x111f   :  { %v1144_v6 = vadd.f32 %v1143_v5, %v1891_v8  ;;  %v1177_v8 = vld [vmem:[%s2159_s5 + $0x10] sm:$0xff]  ;;  %v1561_v17 = vpack.c.bf16 %v1176_v7, %v1175_v15 }
0x1120   :  { %1689 = vtanh.f32 %v1142_v4  ;;  %v1564_v20 = vpack.c.bf16 %v1178_v18, %v1177_v8 }
0x1121   :  { %1691 = vtanh.f32 %v1144_v6  ;;  %1562 = vmatpush3.bf16.msra.mxu0 %v1561_v17 }
0x1122   :  { %1563 = vmatprep.subr.bf16.mxu0 %v1725_v16 }
0x1125   :  { %1565 = vmatpush3.bf16.msra.mxu0 %v1564_v20 }
0x1126   :  { %1566 = vmatprep.subr.bf16.mxu0 %v1725_v16 }
0x1129   :  { %1568 = vmatpush3.bf16.msra.mxu0 %v1567_v25 }
0x112a   :  { %v1690_v9 = vpop.eup %1689  ;;  %1569 = vmatprep.subr.bf16.mxu0 %v1725_v16 }
0x112b   :  { %v1148_v11 = vmul.f32 0.5, %v1690_v9  ;;  %v1692_v13 = vpop.eup %1691 }
0x112c   :  { %v1150_v36 = vmul.f32 0.5, %v1692_v13 }
0x112d   :  { %v1149_v12 = vadd.f32 0.5, %v1148_v11  ;;  %1571 = vmatpush3.bf16.msra.mxu0 %v1570_v31 }
0x112e   :  { %1572 = vmatprep.subr.bf16.mxu0 %v1725_v16  ;;  %v1151_v37 = vadd.f32 0.5, %v1150_v36 }
0x112f   :  { %v1153_v14 = vmul.f32 %v1692_v13, %v1149_v12  ;;  %v1152_v19 = vmul.f32 %v1149_v12, %v1067_v61 }
0x1131   :  { %1155 = vrot.lane.b32.xlu1 %v1153_v14, %s1723_s2  ;;  %1574 = vmatpush3.bf16.msra.mxu0 %v1573_v24 }
0x1132   :  { %1575 = vmatprep.subr.bf16.mxu0 %v1725_v16 }
0x1135   :  { %1577 = vmatpush3.bf16.msra.mxu0 %v1576_v40 }
0x1136   :  { %1578 = vmatprep.subr.bf16.mxu0 %v1725_v16 }
0x1139   :  { %1580 = vmatpush3.bf16.msra.mxu0 %v1579_v44 }
0x113a   :  { %1581 = vmatprep.subr.bf16.mxu0 %v1725_v16 }
0x113d   :  { %1583 = vmatpush3.bf16.msra.mxu0 %v1582_v47 }
0x11a3   :  { %v1156_v35 = vpop.permute.xlu1 %1155 }
0x11a4   :  { %v1158_v23 = vadd.f32 %v1156_v35, %v1152_v19 }
0x11a6   :  { %1693 = vtanh.f32 %v1158_v23 }
0x11b0   :  { %v1694_v42 = vpop.eup %1693 }
0x11b1   :  { %v1160_v43 = vmul.f32 %v1694_v42, %v1151_v37 }
0x11b3   :  { %1167 = vrot.lane.b32.xlu1 %v1160_v43, %s1724_s3  ;;  %s1697_s3 = scalar_lea.vmem %s1277_s1, 32 }
0x11b4   :  { %p1698_p0 = scmp.ne.s32.totalorder %s1277_s1, %s1697_s3  ;;  %p1703_p2 = scmp.lt.s32.totalorder %s1697_s3, %s1697_s3 }
0x11b6   :  { %p1704_p3 = por %p1703_p2, %p1702_p1 }
0x11b8   :  { %p1705_p4 = pnand %p1704_p3, %p1698_p0 }
0x1225   :  { %v1168_v49 = vpop.permute.xlu1 %1167 }
0x1226   :  { %v1171_v50 = vsel %vm435_vm12, %v1170_v48, %v1168_v49 }
0x1227   :  { %v1173_v51 = vsel %vm1172_vm14, %v1171_v50, %v1158_v23 }
0x1228   :  { %1695 = vtanh.f32 %v1173_v51 }
0x1232   :  { %v1696_v10 = vpop.eup %1695 }
0x1233   :  { %1410 = vmatmul.mubr.f32.vlgmr.msra.gmra.mrb[18].mxu0 %v1696_v10 }
0x1306   :  { %v1264_v53 = vpop.f32.mrb[18].mxu0 }
0x1307   :  { %v1265_v54 = vadd.f32 %v1318_v52, %v1264_v53  ;;  %v1411_v55 = vpop.f32.mrb[19].mxu0 }
0x1309   :  { %1269 = vst.msk [vmem:[#allocation2] sm:$0x3] %vm1268_vm15, %v1265_v54 }
0x130a   :  { %1708 = shalt.err (!%p1705_p4)
}
0x130b   :  { %s1709_s14 = scalar_lea.hbm %s2161_s7, 32 }
0x130c   :  { %p1710_p5 = scmp.ne.s32.totalorder %s2161_s7, %s1709_s14  ;;  %p1713_p6 = scmp.lt.u32.totalorder %s1709_s14, %s2161_s7 }
0x130e   :  { %p1715_p7 = pnand %p1713_p6, %p1710_p5 }
0x1310   :  { %1718 = shalt.err (!%p1715_p7)
}
0x1311   :  { %1279 = dma.vmem_to_hbm [thread:$0]  %s1277_s1, 32, %s2161_s7, [#allocation3]  }
0x1312   :  { %1719 = dma.done.wait [#allocation3], 32  }
0x1313   :  { %1720 = vsyncadd [#allocation3], 4294967264 }
0x1314   :  { %1283 = vsyncpa [#allocation3], 1 }

</bundles_post_ra>
